<compile_context>
chip_gen: v5e
topology: v5e:2x2
jax: 0.10.0
libtpu: 0.0.40
codegen_flags: <defaults>
</compile_context>

<pallas_src>
import functools

import jax
import jax.numpy as jnp
from jax.experimental import pallas as pl
from jax.experimental.pallas import tpu as pltpu

TIME_WINDOW = 8  # the original file uses a module-level global `time_window`


def _expand_lanes_exact(x_f32, r_bf16):
    """Exact lane-expansion y[:, w*T + t] = x[:, w] via the MXU.

    `r_bf16` is the 0/1 expansion matrix R[w, w*T + t] = 1 in bfloat16.  The
    float32 input is split into three bf16-exact parts (<= 8 mantissa bits
    each) so the bf16 MXU matmul with f32 accumulation reconstructs x exactly.
    """
    h1 = x_f32.astype(jnp.bfloat16)
    e1 = x_f32 - h1.astype(jnp.float32)
    h2 = e1.astype(jnp.bfloat16)
    e2 = (e1 - h2.astype(jnp.float32)).astype(jnp.bfloat16)
    dot = lambda p: jnp.dot(p, r_bf16, preferred_element_type=jnp.float32)
    return (dot(h1) + dot(h2)) + dot(e2)


def _make_encode_kernel(scheme: int, time_window: int):
    """Build the kernel body for one encoding scheme (time axis fused)."""
    T = time_window

    if scheme == 1:  # current_coding: broadcast x along the fused time lanes
        def kernel(x_ref, r_ref, o_ref):
            o_ref[...] = _expand_lanes_exact(
                x_ref[...], r_ref[...]).astype(o_ref.dtype)

    elif scheme == 2:  # Poisson_coding: spike = (x > U[0,1)), fresh per step
        def kernel(x_ref, r_ref, u_ref, o_ref):
            xr = _expand_lanes_exact(x_ref[...], r_ref[...])
            o_ref[...] = (xr > u_ref[...]).astype(o_ref.dtype)

    elif scheme in (3, 4):  # Rate_Syn / TTFS
        def kernel(x_ref, r_ref, s_ref, o_ref):
            x = x_ref[...]
            # t = int((1 - x) * T): trunc toward zero like torch .int(),
            # computed once per input element then lane-expanded on the MXU
            # (small integers are bf16-exact, so the expansion is exact).
            t0 = ((1.0 - x) * T).astype(jnp.int32)
            t0 = t0.astype(jnp.float32).astype(jnp.bfloat16)
            t0r = jnp.dot(t0, r_ref[...], preferred_element_type=jnp.float32)
            step = s_ref[...]  # (1, W*T) f32 constant row: step = lane % T
            spike = (step >= t0r) if scheme == 3 else (step == t0r)
            o_ref[...] = spike.astype(o_ref.dtype)
    else:
        raise ValueError(f"unknown scheme {scheme}")
    return kernel


def _choose_tile_m(M, W, T, n_wide_streams):
    """M-tile size: multiple of 8, double-buffered working set <= ~12 MiB so
    the pipeline fits comfortably on v5e (16 MiB default scoped) and v7x
    (64 MiB physical VMEM)."""
    WT = W * T
    per_row = 4 * (W + n_wide_streams * WT)   # f32 bytes per tile row
    budget = 12 * 1024 * 1024
    tm = budget // (2 * per_row)              # 2x for double buffering
    tm = min(int(tm), 1024, M)
    tm = max(8, (tm // 8) * 8)
    return M if tm >= M else tm


@functools.partial(jax.jit, static_argnames=("schemes", "time_window", "out_dtype"))
def encodelayer_forward(x, schemes: int = 1, time_window: int = TIME_WINDOW,
                        seed=0, out_dtype=jnp.float32):
    """Forward pass of `encodelayer` for NCHW input x -> (B, C, H, W, T)."""
    B, C, H, W = x.shape
    T = int(time_window)
    M, WT = B * C * H, W * T
    x2 = x.reshape(M, W).astype(jnp.float32)

    # 0/1 lane-expansion matrix R[w, w*T + t] = 1 (bf16, feeds the MXU).
    lane = jnp.arange(WT, dtype=jnp.int32)[None, :]
    r_mat = (lane // T ==
             jnp.arange(W, dtype=jnp.int32)[:, None]).astype(jnp.bfloat16)

    tm = _choose_tile_m(M, W, T, n_wide_streams=2 if schemes == 2 else 1)
    grid = (pl.cdiv(M, tm),)

    inputs = [x2, r_mat]
    in_specs = [pl.BlockSpec((tm, W), lambda i: (i, 0)),
                pl.BlockSpec((W, WT), lambda i: (0, 0))]
    extra_bytes = 0
    if schemes == 2:
        # TODO(synk): when a CPU/interpret fallback is not required, generate
        # these in-kernel with pltpu.prng_seed/prng_random_bits (seeded per
        # tile with pl.program_id) to avoid streaming (M, W*T) uniforms from HBM.
        u = jax.random.uniform(jax.random.PRNGKey(seed), (M, WT),
                               dtype=jnp.float32)
        inputs.append(u)
        in_specs.append(pl.BlockSpec((tm, WT), lambda i: (i, 0)))
        extra_bytes = 4 * M * WT
    elif schemes in (3, 4):
        step_row = (jnp.arange(WT, dtype=jnp.int32) % T
                    ).astype(jnp.float32)[None, :]
        inputs.append(step_row)
        in_specs.append(pl.BlockSpec((1, WT), lambda i: (0, 0)))

    out_itemsize = jnp.dtype(out_dtype).itemsize
    cost = pl.CostEstimate(
        flops=int(6 * M * W * WT + 4 * M * WT),
        transcendentals=0,
        bytes_accessed=int(4 * M * W + out_itemsize * M * WT
                           + 2 * W * WT + extra_bytes))

    out2 = pl.pallas_call(
        _make_encode_kernel(schemes, T),
        out_shape=jax.ShapeDtypeStruct((M, WT), out_dtype),
        grid=grid,
        in_specs=in_specs,
        out_specs=pl.BlockSpec((tm, WT), lambda i: (i, 0)),
        compiler_params=pltpu.CompilerParams(
            dimension_semantics=("parallel",),
            vmem_limit_bytes=32 * 1024 * 1024),
        cost_estimate=cost,
    )(*inputs)

    # Row-major (M, W*T) is exactly row-major (B, C, H, W, T): free reshape,
    # no transpose, matching the PyTorch output layout.
    return out2.reshape(B, C, H, W, T)


# ------------------------- pure-JAX references -------------------------------
def _ref_current_coding(x, T):
    return jnp.broadcast_to(x[..., None], x.shape + (T,)).astype(jnp.float32)


def _ref_rate_syn(x, T):
    t = ((1.0 - x) * T).astype(jnp.int32)
    steps = jnp.arange(T, dtype=jnp.int32)
    return jnp.where(steps >= t[..., None], 1.0, 0.0).astype(jnp.float32)


def _ref_ttfs(x, T):
    t = ((1.0 - x) * T).astype(jnp.int32)
    steps = jnp.arange(T, dtype=jnp.int32)
    return jnp.where(steps == t[..., None], 1.0, 0.0).astype(jnp.float32)


if __name__ == "__main__":
    key = jax.random.PRNGKey(0)
    B, C, H, W = 2, 4, 16, 16
    # inputs in [0, 1), as expected by the rate/TTFS encoders
    x = jax.random.uniform(key, (B, C, H, W), dtype=jnp.float32)
    T = TIME_WINDOW

    # scheme 1 (module default): current_coding
    y1 = jax.block_until_ready(encodelayer_forward(x, schemes=1))
    assert y1.shape == (B, C, H, W, T)
    assert jnp.allclose(y1, _ref_current_coding(x, T))

    # scheme 3: Rate_Syn
    y3 = jax.block_until_ready(encodelayer_forward(x, schemes=3))
    assert jnp.allclose(y3, _ref_rate_syn(x, T))

    # scheme 4: TTFS
    y4 = jax.block_until_ready(encodelayer_forward(x, schemes=4))
    assert jnp.allclose(y4, _ref_ttfs(x, T))

    # scheme 2: Poisson_coding (stochastic; check it is a valid spike train
    # whose mean rate tracks x)
    y2 = jax.block_until_ready(encodelayer_forward(x, schemes=2, seed=1234))
    assert y2.shape == (B, C, H, W, T)
    assert jnp.all((y2 == 0.0) | (y2 == 1.0))
    assert jnp.abs(y2.mean() - x.mean()) < 0.05

    print("KERNEL_OK")
</pallas_src>

<mosaic_0001>
module attributes {stable_mosaic.version = 11 : i64} {
  func.func @kernel(%arg0: i32, %arg1: memref<128x16xf32, #tpu.memory_space<vmem>>, %arg2: memref<16x128xbf16, #tpu.memory_space<vmem>>, %arg3: memref<128x128xf32, #tpu.memory_space<vmem>>) attributes {dimension_semantics = [#tpu.dimension_semantics<parallel>], iteration_bounds = array<i64: 1>, scalar_prefetch = 0 : i64, scratch_operands = 0 : i64, tpu.core_type = #tpu.core_type<tc>, window_params = [{transform_indices = @transform_0, window_bounds = array<i64: 128, 16>}, {pipeline_mode = #tpu.pipeline_mode<synchronous>, transform_indices = @transform_1, window_bounds = array<i64: 16, 128>}, {transform_indices = @transform_2, window_bounds = array<i64: 128, 128>}]} {
    %c0 = arith.constant 0 : index
    %c0_0 = arith.constant 0 : index
    %0 = vector.load %arg1[%c0, %c0_0] : memref<128x16xf32, #tpu.memory_space<vmem>>, vector<128x16xf32>
    %c0_1 = arith.constant 0 : index
    %c0_2 = arith.constant 0 : index
    %1 = vector.load %arg2[%c0_1, %c0_2] : memref<16x128xbf16, #tpu.memory_space<vmem>>, vector<16x128xbf16>
    %2 = arith.truncf %0 : vector<128x16xf32> to vector<128x16xbf16>
    %3 = arith.extf %2 : vector<128x16xbf16> to vector<128x16xf32>
    %4 = arith.subf %0, %3 : vector<128x16xf32>
    %5 = arith.truncf %4 : vector<128x16xf32> to vector<128x16xbf16>
    %6 = arith.extf %5 : vector<128x16xbf16> to vector<128x16xf32>
    %7 = arith.subf %4, %6 : vector<128x16xf32>
    %8 = arith.truncf %7 : vector<128x16xf32> to vector<128x16xbf16>
    %cst = arith.constant dense<0.000000e+00> : vector<128x128xf32>
    %9 = tpu.matmul %2, %1, %cst {dimension_numbers = #tpu.dot_dimension_numbers<[1], [0], [0], [1], [0, 0, 1, 1], [], []>} : vector<128x16xbf16>, vector<16x128xbf16>, vector<128x128xf32> -> vector<128x128xf32>
    %cst_3 = arith.constant dense<0.000000e+00> : vector<128x128xf32>
    %10 = tpu.matmul %5, %1, %cst_3 {dimension_numbers = #tpu.dot_dimension_numbers<[1], [0], [0], [1], [0, 0, 1, 1], [], []>} : vector<128x16xbf16>, vector<16x128xbf16>, vector<128x128xf32> -> vector<128x128xf32>
    %11 = arith.addf %9, %10 : vector<128x128xf32>
    %cst_4 = arith.constant dense<0.000000e+00> : vector<128x128xf32>
    %12 = tpu.matmul %8, %1, %cst_4 {dimension_numbers = #tpu.dot_dimension_numbers<[1], [0], [0], [1], [0, 0, 1, 1], [], []>} : vector<128x16xbf16>, vector<16x128xbf16>, vector<128x128xf32> -> vector<128x128xf32>
    %13 = arith.addf %11, %12 : vector<128x128xf32>
    %c0_5 = arith.constant 0 : index
    %c0_6 = arith.constant 0 : index
    %14 = vector.load %arg3[%c0_5, %c0_6] : memref<128x128xf32, #tpu.memory_space<vmem>>, vector<128x128xf32>
    tpu.vector_store %arg3[%c0_5, %c0_6], %13 {strides = array<i32>} : memref<128x128xf32, #tpu.memory_space<vmem>>, vector<128x128xf32>,
    return
  }
  func.func @transform_0(%arg0: i32) -> (i32, i32) {
    %c0_i32 = arith.constant 0 : i32
    %c0_i32_0 = arith.constant 0 : i32
    return %arg0, %c0_i32 : i32, i32
  }
  func.func @transform_1(%arg0: i32) -> (i32, i32) {
    %c0_i32 = arith.constant 0 : i32
    %c0_i32_0 = arith.constant 0 : i32
    %c0_i32_1 = arith.constant 0 : i32
    return %c0_i32, %c0_i32_0 : i32, i32
  }
  func.func @transform_2(%arg0: i32) -> (i32, i32) {
    %c0_i32 = arith.constant 0 : i32
    %c0_i32_0 = arith.constant 0 : i32
    return %arg0, %c0_i32 : i32, i32
  }
}

</mosaic_0001>

<bundles_post_ra>
// kernel: encodelayer_forward.1
= control target key start
LH: loop header
LB: loop body
LE: loop exit
PB: predicated region body
PF: predicated region fallthrough
CT: control target
= control target key end

     0   :  { %7 = vsyncpa [#allocation3], 0  ;;  %s554_s12 = smov [#allocation2]   ;;  %s555_s14 = smov 128   ;;  %s716_s0 = inlined_call_operand.hbm [shape: f32[128,16], index: 0, kind: input, shape index: {}]   ;;  %s717_s1 = inlined_call_operand.vmem [shape: bf16[16,128], index: 1, kind: input, shape index: {}]   ;;  %s718_s2 = inlined_call_operand.vmem [shape: f32[128,128], index: 2, kind: output, shape index: {}]  }
   0x1   :  { %s12_s11 = sshll.u32 %s716_s0, 4  ;;  %s14_s13 = sshll.u32 %s554_s12, 4  ;;  %s13_s11 = int_to_ptr.hbm [resolvable:$true] %s12_s11  ;;  %s15_s13 = int_to_ptr.vmem [resolvable:$true] %s14_s13 }
   0x2   :  { %s556_s15 = smov 8  }
   0x3   :  { %20 = dma.hbm_to_vmem [thread:$0]  %s13_s11, 2048, %s15_s13, [#allocation3], %s555_s14, %s555_s14, %s556_s15  }
   0x4   :  { %552 = dma.done.wait [#allocation3], 2048  }
   0x5   :  { %553 = vsyncadd [#allocation3], 4294965248  ;;  %v578_v0 = vld [vmem:[%s717_s1] sm:$0xff]  ;;  %v29_v2 = vld [vmem:[#allocation2 + $0x8] sm:$0xff]  ;;  %vm196_vm0 = vcmask 130048  }
   0x6   :  { %v28_v1 = vld [vmem:[#allocation2] sm:$0xff]  ;;  %v47_v4 = vpack.c.bf16 %v29_v2, %v29_v2  ;;  %v41_v6 = vld [vmem:[#allocation2 + $0x68] sm:$0xff]  ;;  %v30_v7 = vld [vmem:[#allocation2 + $0x10] sm:$0xff]  ;;  %341 = vmatpush.bf16.msra.mxu1 %v578_v0  ;;  %228 = vmatpush.bf16.msra.mxu0 %v578_v0 }
   0x7   :  { %v46_v3 = vpack.c.bf16 %v28_v1, %v28_v1  ;;  %v40_v5 = vld [vmem:[#allocation2 + $0x60] sm:$0xff]  ;;  %v584_v9 = vpack.c.bf16 %v41_v6, %v41_v6  ;;  %v31_v10 = vld [vmem:[#allocation2 + $0x18] sm:$0xff]  ;;  %v48_v11 = vpack.c.bf16 %v30_v7, %v30_v7  ;;  %522 = vmatpush.bf16.msra.mxu3 %v578_v0  ;;  %414 = vmatpush.bf16.msra.mxu2 %v578_v0  ;;  %v42_v22 = vld [vmem:[#allocation2 + $0x70] sm:$0xff] }
   0x8   :  { %v582_v8 = vpack.c.bf16 %v40_v5, %v40_v5  ;;  %v63_v13 = vunpack.c.l.bf16 %v47_v4  ;;  %v287_v15 = vunpack.c.l.b16 %v47_v4  ;;  %v49_v18 = vpack.c.bf16 %v31_v10, %v31_v10  ;;  %v43_v39 = vld [vmem:[#allocation2 + $0x78] sm:$0xff]  ;;  %v32_v54 = vld [vmem:[#allocation2 + $0x20] sm:$0xff]  ;;  %v33_v55 = vld [vmem:[#allocation2 + $0x28] sm:$0xff] }
   0x9   :  { %v62_v12 = vunpack.c.l.bf16 %v46_v3  ;;  %v286_v14 = vunpack.c.l.b16 %v46_v3  ;;  %v75_v17 = vunpack.c.l.bf16 %v584_v9  ;;  %v64_v25 = vunpack.c.l.bf16 %v48_v11 }
   0xa   :  { %v74_v16 = vunpack.c.l.bf16 %v582_v8  ;;  %v79_v21 = vsub.f32 %v29_v2, %v63_v13  ;;  %v65_v28 = vunpack.c.l.bf16 %v49_v18  ;;  %v604_v31 = vpack.c.bf16 %v42_v22, %v42_v22 }
   0xb   :  { %523 = vmatpush.bf16.msrb.mxu3 %v578_v0  ;;  %v302_v19 = vpack.c.b16 %v287_v15, %v286_v14  ;;  %v78_v20 = vsub.f32 %v28_v1, %v62_v12  ;;  %v593_v24 = vsub.f32 %v41_v6, %v75_v17  ;;  %v80_v38 = vsub.f32 %v30_v7, %v64_v25 }
   0xc   :  { %v591_v23 = vsub.f32 %v40_v5, %v74_v16  ;;  %v95_v27 = vpack.c.bf16 %v79_v21, %v79_v21  ;;  %v81_v43 = vsub.f32 %v31_v10, %v65_v28  ;;  %v609_v46 = vpack.c.bf16 %v43_v39, %v43_v39 }
   0xd   :  { %505 = vmatmul.msk.bf16.vlgmr.msra.gmra.mxu1 %vm196_vm0, %v302_v19  ;;  %v94_v26 = vpack.c.bf16 %v78_v20, %v78_v20  ;;  %v602_v30 = vpack.c.bf16 %v593_v24, %v593_v24  ;;  %v76_v47 = vunpack.c.l.bf16 %v604_v31  ;;  %v288_v48 = vunpack.c.l.b16 %v48_v11  ;;  %v34_v19 = vld [vmem:[#allocation2 + $0x30] sm:$0xff] }
   0xe   :  { %v598_v29 = vpack.c.bf16 %v591_v23, %v591_v23  ;;  %v167_v33 = vunpack.c.l.b16 %v95_v27  ;;  %v111_v35 = vunpack.c.l.bf16 %v95_v27  ;;  %v289_v49 = vunpack.c.l.b16 %v49_v18 }
   0xf   :  { %v166_v32 = vunpack.c.l.b16 %v94_v26  ;;  %v110_v34 = vunpack.c.l.bf16 %v94_v26  ;;  %v179_v37 = vunpack.c.l.b16 %v602_v30  ;;  %v96_v50 = vpack.c.bf16 %v80_v38, %v80_v38 }
  0x10   :  { %v178_v36 = vunpack.c.l.b16 %v598_v29  ;;  %v127_v42 = vsub.f32 %v79_v21, %v111_v35  ;;  %v97_v51 = vpack.c.bf16 %v81_v43, %v81_v43  ;;  %v77_v52 = vunpack.c.l.bf16 %v609_v46 }
  0x11   :  { %v182_v40 = vpack.c.b16 %v167_v33, %v166_v32  ;;  %v126_v41 = vsub.f32 %v78_v20, %v110_v34  ;;  %v615_v53 = vsub.f32 %v42_v22, %v76_v47  ;;  %v303_v57 = vpack.c.b16 %v289_v49, %v288_v48  ;;  %v35_v20 = vld [vmem:[#allocation2 + $0x38] sm:$0xff]  ;;  %v37_v49 = vld [vmem:[#allocation2 + $0x48] sm:$0xff] }
  0x12   :  { %v188_v44 = vpack.c.b16 %v179_v37, %v178_v36  ;;  %v618_v56 = vsub.f32 %v43_v39, %v77_v52  ;;  %v112_v59 = vunpack.c.l.bf16 %v96_v50  ;;  %v113_v61 = vunpack.c.l.bf16 %v97_v51 }
  0x13   :  { %497 = vmatmul.msk.bf16.vlgmr.msra.gmra.mxu0 %vm196_vm0, %v182_v40  ;;  %v142_v45 = vpack.c.bf16 %v127_v42, %v126_v41  ;;  %v622_v58 = vpack.c.bf16 %v615_v53, %v615_v53  ;;  %v50_v62 = vpack.c.bf16 %v32_v54, %v32_v54  ;;  %v51_v63 = vpack.c.bf16 %v33_v55, %v33_v55 }
  0x14   :  { %503 = vmatmul.msk.bf16.vlgmr.msra.gmra.mxu3 %vm196_vm0, %v188_v44  ;;  %v626_v60 = vpack.c.bf16 %v618_v56, %v618_v56  ;;  %v168_v1 = vunpack.c.l.b16 %v96_v50  ;;  %v169_v2 = vunpack.c.l.b16 %v97_v51  ;;  %v128_v4 = vsub.f32 %v80_v38, %v112_v59 }
  0x15   :  { %513 = vmatmul.msk.bf16.vlgmr.msra.gmra.mxu2 %vm196_vm0, %v142_v45  ;;  %524 = vmatpush.bf16.msra.mxu3 %v578_v0  ;;  %v180_v0 = vunpack.c.l.b16 %v622_v58  ;;  %v129_v5 = vsub.f32 %v81_v43, %v113_v61  ;;  %v66_v6 = vunpack.c.l.bf16 %v50_v62  ;;  %v67_v7 = vunpack.c.l.bf16 %v51_v63 }
  0x16   :  { %v181_v3 = vunpack.c.l.b16 %v626_v60  ;;  %v183_v10 = vpack.c.b16 %v169_v2, %v168_v1  ;;  %v290_v15 = vunpack.c.l.b16 %v50_v62  ;;  %v291_v16 = vunpack.c.l.b16 %v51_v63 }
  0x17   :  { %v143_v12 = vpack.c.bf16 %v129_v5, %v128_v4  ;;  %v82_v13 = vsub.f32 %v32_v54, %v66_v6  ;;  %v83_v14 = vsub.f32 %v33_v55, %v67_v7  ;;  %v52_v21 = vpack.c.bf16 %v34_v19, %v34_v19 }
  0x18   :  { %v189_v11 = vpack.c.b16 %v181_v3, %v180_v0  ;;  %v304_v22 = vpack.c.b16 %v291_v16, %v290_v15  ;;  %v53_v27 = vpack.c.bf16 %v35_v20, %v35_v20  ;;  %v122_v28 = vunpack.c.l.bf16 %v598_v29  ;;  %v38_v15 = vld [vmem:[#allocation2 + $0x50] sm:$0xff]  ;;  %v39_v16 = vld [vmem:[#allocation2 + $0x58] sm:$0xff] }
  0x19   :  { %v98_v17 = vpack.c.bf16 %v82_v13, %v82_v13  ;;  %v99_v18 = vpack.c.bf16 %v83_v14, %v83_v14  ;;  %v123_v32 = vunpack.c.l.bf16 %v602_v30  ;;  %v298_v35 = vunpack.c.l.b16 %v582_v8 }
  0x1a   :  { %v299_v36 = vunpack.c.l.b16 %v584_v9  ;;  %v68_v39 = vunpack.c.l.bf16 %v52_v21  ;;  %v69_v40 = vunpack.c.l.bf16 %v53_v27  ;;  %v640_v41 = vsub.f32 %v591_v23, %v122_v28 }
  0x1b   :  { %v114_v25 = vunpack.c.l.bf16 %v98_v17  ;;  %v115_v26 = vunpack.c.l.bf16 %v99_v18  ;;  %v170_v33 = vunpack.c.l.b16 %v98_v17  ;;  %v171_v34 = vunpack.c.l.b16 %v99_v18 }
  0x1c   :  { %v643_v42 = vsub.f32 %v593_v24, %v123_v32  ;;  %v308_v30 = vpack.c.b16 %v299_v36, %v298_v35  ;;  %v84_v44 = vsub.f32 %v34_v19, %v68_v39  ;;  %v85_v45 = vsub.f32 %v35_v20, %v69_v40  ;;  %v36_v24 = vld [vmem:[#allocation2 + $0x40] sm:$0xff] }
  0x1d   :  { %506 = vmatmul.msk.bf16.gmra.mxu1 %vm196_vm0, %v303_v57  ;;  %v130_v37 = vsub.f32 %v82_v13, %v114_v25  ;;  %v131_v38 = vsub.f32 %v83_v14, %v115_v26  ;;  %v184_v29 = vpack.c.b16 %v171_v34, %v170_v33  ;;  %v292_v9 = vunpack.c.l.b16 %v52_v21 }
  0x1e   :  { %v148_v8 = vpack.c.bf16 %v643_v42, %v640_v41  ;;  %v293_v47 = vunpack.c.l.b16 %v53_v27  ;;  %v100_v23 = vpack.c.bf16 %v84_v44, %v84_v44  ;;  %v101_v48 = vpack.c.bf16 %v85_v45, %v85_v45 }
  0x1f   :  { %v144_v43 = vpack.c.bf16 %v131_v38, %v130_v37  ;;  %v54_v54 = vpack.c.bf16 %v36_v24, %v36_v24  ;;  %v55_v55 = vpack.c.bf16 %v37_v49, %v37_v49  ;;  %v300_v61 = vunpack.c.l.b16 %v604_v31 }
  0x20   :  { %v305_v50 = vpack.c.b16 %v293_v47, %v292_v9  ;;  %v116_v51 = vunpack.c.l.bf16 %v100_v23  ;;  %v117_v52 = vunpack.c.l.bf16 %v101_v48  ;;  %v172_v57 = vunpack.c.l.b16 %v100_v23 }
  0x21   :  { %v173_v59 = vunpack.c.l.b16 %v101_v48  ;;  %v301_v62 = vunpack.c.l.b16 %v609_v46  ;;  %v70_v2 = vunpack.c.l.bf16 %v54_v54  ;;  %v71_v0 = vunpack.c.l.bf16 %v55_v55 }
  0x22   :  { %v132_v63 = vsub.f32 %v84_v44, %v116_v51  ;;  %v133_v1 = vsub.f32 %v85_v45, %v117_v52  ;;  %v124_v3 = vunpack.c.l.bf16 %v622_v58  ;;  %v125_v4 = vunpack.c.l.bf16 %v626_v60 }
  0x23   :  { %498 = vmatmul.msk.bf16.gmra.mxu0 %vm196_vm0, %v183_v10  ;;  %v185_v5 = vpack.c.b16 %v173_v59, %v172_v57  ;;  %v309_v6 = vpack.c.b16 %v301_v62, %v300_v61  ;;  %v86_v31 = vsub.f32 %v36_v24, %v70_v2  ;;  %v294_v13 = vunpack.c.l.b16 %v54_v54 }
  0x24   :  { %504 = vmatmul.msk.bf16.gmra.mxu3 %vm196_vm0, %v189_v11  ;;  %v140_v7 = vsub.f32 %v615_v53, %v124_v3  ;;  %v141_v10 = vsub.f32 %v618_v56, %v125_v4  ;;  %v145_v11 = vpack.c.bf16 %v133_v1, %v132_v63  ;;  %v295_v14 = vunpack.c.l.b16 %v55_v55 }
  0x25   :  { %514 = vmatmul.msk.bf16.gmra.mxu2 %vm196_vm0, %v143_v12  ;;  %v87_v12 = vsub.f32 %v37_v49, %v71_v0  ;;  %v102_v58 = vpack.c.bf16 %v86_v31, %v86_v31  ;;  %v56_v56 = vpack.c.bf16 %v38_v15, %v38_v15  ;;  %v57_v19 = vpack.c.bf16 %v39_v16, %v39_v16 }
  0x26   :  { %v149_v46 = vpack.c.bf16 %v141_v10, %v140_v7  ;;  %v306_v17 = vpack.c.b16 %v295_v14, %v294_v13 }
  0x27   :  { %v103_v60 = vpack.c.bf16 %v87_v12, %v87_v12  ;;  %v118_v53 = vunpack.c.l.bf16 %v102_v58  ;;  %v174_v20 = vunpack.c.l.b16 %v102_v58  ;;  %v72_v26 = vunpack.c.l.bf16 %v56_v56 }
  0x28   :  { %v73_v27 = vunpack.c.l.bf16 %v57_v19  ;;  %v296_v35 = vunpack.c.l.b16 %v56_v56  ;;  %v297_v36 = vunpack.c.l.b16 %v57_v19 }
  0x29   :  { %v119_v18 = vunpack.c.l.bf16 %v103_v60  ;;  %v175_v21 = vunpack.c.l.b16 %v103_v60  ;;  %v88_v33 = vsub.f32 %v38_v15, %v72_v26 }
  0x2a   :  { %v89_v34 = vsub.f32 %v39_v16, %v73_v27  ;;  %v307_v39 = vpack.c.b16 %v297_v36, %v296_v35 }
  0x2b   :  { %v135_v25 = vsub.f32 %v87_v12, %v119_v18  ;;  %v186_v28 = vpack.c.b16 %v175_v21, %v174_v20  ;;  %v104_v37 = vpack.c.bf16 %v88_v33, %v88_v33 }
  0x2c   :  { %v105_v38 = vpack.c.bf16 %v89_v34, %v89_v34 }
  0x2d   :  { %507 = vmatmul.msk.bf16.gmra.mxu1 %vm196_vm0, %v304_v22  ;;  %v134_v22 = vsub.f32 %v86_v31, %v118_v53  ;;  %v120_v40 = vunpack.c.l.bf16 %v104_v37  ;;  %v176_v42 = vunpack.c.l.b16 %v104_v37 }
  0x2e   :  { %v121_v41 = vunpack.c.l.bf16 %v105_v38 }
  0x2f   :  { %v146_v32 = vpack.c.bf16 %v135_v25, %v134_v22 }
  0x33   :  { %499 = vmatmul.msk.bf16.gmra.mxu0 %vm196_vm0, %v184_v29  ;;  %v177_v29 = vunpack.c.l.b16 %v105_v38 }
  0x34   :  { %511 = vmatmul.msk.bf16.vlgmr.msrb.gmra.mxu3 %vm196_vm0, %v308_v30  ;;  %v136_v30 = vsub.f32 %v88_v33, %v120_v40 }
  0x35   :  { %515 = vmatmul.msk.bf16.gmra.mxu2 %vm196_vm0, %v144_v43  ;;  %v137_v43 = vsub.f32 %v89_v34, %v121_v41  ;;  %v187_v44 = vpack.c.b16 %v177_v29, %v176_v42 }
  0x37   :  { %v147_v45 = vpack.c.bf16 %v137_v43, %v136_v30 }
  0x3d   :  { %508 = vmatmul.msk.bf16.gmra.mxu1 %vm196_vm0, %v305_v50 }
  0x43   :  { %500 = vmatmul.msk.bf16.gmra.mxu0 %vm196_vm0, %v185_v5 }
  0x44   :  { %512 = vmatmul.msk.bf16.gmra.mxu3 %vm196_vm0, %v309_v6 }
  0x45   :  { %516 = vmatmul.msk.bf16.gmra.mxu2 %vm196_vm0, %v145_v11 }
  0x4d   :  { %509 = vmatmul.msk.bf16.gmra.mxu1 %vm196_vm0, %v306_v17 }
  0x53   :  { %501 = vmatmul.msk.bf16.gmra.mxu0 %vm196_vm0, %v186_v28 }
  0x54   :  { %519 = vmatmul.msk.bf16.vlgmr.msra.gmra.mxu3 %vm196_vm0, %v148_v8 }
  0x55   :  { %517 = vmatmul.msk.bf16.gmra.mxu2 %vm196_vm0, %v146_v32 }
  0x5d   :  { %510 = vmatmul.msk.bf16.gmra.mxu1 %vm196_vm0, %v307_v39 }
  0x63   :  { %502 = vmatmul.msk.bf16.gmra.mxu0 %vm196_vm0, %v187_v44 }
  0x64   :  { %520 = vmatmul.msk.bf16.gmra.mxu3 %vm196_vm0, %v149_v46 }
  0x65   :  { %518 = vmatmul.msk.bf16.gmra.mxu2 %vm196_vm0, %v147_v45 }
  0x8a   :  { %v343_v8 = vpop.f32.mrf.mxu1 }
  0x90   :  { %v230_v9 = vpop.f32.mrf.mxu0 }
  0x91   :  { %v344_v23 = vadd.f32 %v343_v8, %v230_v9 }
  0x92   :  { %v345_v47 = vpop.f32.mrf.mxu1 }
  0x97   :  { %v260_v48 = vpop.f32.mrf.mxu3 }
  0x98   :  { %v232_v24 = vpop.f32.mrf.mxu0  ;;  %v416_v49 = vpop.f32.mrf.mxu2 }
  0x99   :  { %v456_v50 = vadd.f32 %v416_v49, %v344_v23  ;;  %v346_v52 = vadd.f32 %v345_v47, %v232_v24 }
  0x9a   :  { %v348_v51 = vpop.f32.mrf.mxu1 }
  0x9b   :  { %472 = vst [vmem:[%s718_s2] sm:$0xff] %v456_v50 }
  0x9f   :  { %v262_v54 = vpop.f32.mrf.mxu3 }
  0xa0   :  { %v235_v55 = vpop.f32.mrf.mxu0  ;;  %v418_v57 = vpop.f32.mrf.mxu2 }
  0xa1   :  { %v457_v59 = vadd.f32 %v418_v57, %v346_v52  ;;  %v349_v62 = vadd.f32 %v348_v51, %v235_v55 }
  0xa2   :  { %v350_v61 = vpop.f32.mrf.mxu1 }
  0xa3   :  { %473 = vst [vmem:[%s718_s2 + $0x8] sm:$0xff] %v457_v59 }
  0xa7   :  { %v265_v63 = vpop.f32.mrf.mxu3 }
  0xa8   :  { %v237_v1 = vpop.f32.mrf.mxu0  ;;  %v421_v2 = vpop.f32.mrf.mxu2 }
  0xa9   :  { %v458_v0 = vadd.f32 %v421_v2, %v349_v62  ;;  %v351_v4 = vadd.f32 %v350_v61, %v237_v1 }
  0xaa   :  { %v353_v3 = vpop.f32.mrf.mxu1 }
  0xab   :  { %474 = vst [vmem:[%s718_s2 + $0x10] sm:$0xff] %v458_v0 }
  0xaf   :  { %v267_v5 = vpop.f32.mrf.mxu3 }
  0xb0   :  { %v240_v6 = vpop.f32.mrf.mxu0  ;;  %v423_v7 = vpop.f32.mrf.mxu2 }
  0xb1   :  { %v459_v10 = vadd.f32 %v423_v7, %v351_v4  ;;  %v354_v31 = vadd.f32 %v353_v3, %v240_v6 }
  0xb2   :  { %v355_v11 = vpop.f32.mrf.mxu1 }
  0xb3   :  { %475 = vst [vmem:[%s718_s2 + $0x18] sm:$0xff] %v459_v10 }
  0xb7   :  { %v373_v12 = vpop.f32.mrf.mxu3 }
  0xb8   :  { %v242_v46 = vpop.f32.mrf.mxu0  ;;  %v426_v13 = vpop.f32.mrf.mxu2  ;;  %v374_v35 = vadd.f32 %v373_v12, %v260_v48 }
  0xb9   :  { %v460_v14 = vadd.f32 %v426_v13, %v354_v31  ;;  %v356_v60 = vadd.f32 %v355_v11, %v242_v46 }
  0xba   :  { %v358_v58 = vpop.f32.mrf.mxu1 }
  0xbb   :  { %476 = vst [vmem:[%s718_s2 + $0x20] sm:$0xff] %v460_v14 }
  0xbf   :  { %v375_v15 = vpop.f32.mrf.mxu3 }
  0xc0   :  { %v245_v16 = vpop.f32.mrf.mxu0  ;;  %v428_v17 = vpop.f32.mrf.mxu2  ;;  %v376_v42 = vadd.f32 %v375_v15, %v262_v54 }
  0xc1   :  { %v461_v53 = vadd.f32 %v428_v17, %v356_v60  ;;  %v359_v18 = vadd.f32 %v358_v58, %v245_v16 }
  0xc2   :  { %v360_v56 = vpop.f32.mrf.mxu1 }
  0xc3   :  { %477 = vst [vmem:[%s718_s2 + $0x28] sm:$0xff] %v461_v53 }
  0xc7   :  { %v378_v19 = vpop.f32.mrf.mxu3 }
  0xc8   :  { %v247_v20 = vpop.f32.mrf.mxu0  ;;  %v431_v21 = vpop.f32.mrf.mxu2  ;;  %v379_v23 = vadd.f32 %v378_v19, %v265_v63 }
  0xc9   :  { %v462_v22 = vadd.f32 %v431_v21, %v359_v18  ;;  %v361_v25 = vadd.f32 %v360_v56, %v247_v20 }
  0xca   :  { %v363_v26 = vpop.f32.mrf.mxu1 }
  0xcb   :  { %478 = vst [vmem:[%s718_s2 + $0x30] sm:$0xff] %v462_v22 }
  0xcf   :  { %v380_v27 = vpop.f32.mrf.mxu3 }
  0xd0   :  { %v250_v28 = vpop.f32.mrf.mxu0  ;;  %v433_v32 = vpop.f32.mrf.mxu2  ;;  %v381_v52 = vadd.f32 %v380_v27, %v267_v5 }
  0xd1   :  { %v463_v33 = vadd.f32 %v433_v32, %v361_v25  ;;  %v364_v34 = vadd.f32 %v363_v26, %v250_v28 }
  0xd2   :  { %v365_v41 = vpop.f32.mrf.mxu1 }
  0xd3   :  { %479 = vst [vmem:[%s718_s2 + $0x38] sm:$0xff] %v463_v33 }
  0xd7   :  { %v446_v36 = vpop.f32.mrf.mxu3 }
  0xd8   :  { %v468_v37 = vadd.f32 %v446_v36, %v374_v35  ;;  %v252_v38 = vpop.f32.mrf.mxu0  ;;  %v436_v39 = vpop.f32.mrf.mxu2 }
  0xd9   :  { %v464_v40 = vadd.f32 %v436_v39, %v364_v34  ;;  %v366_v29 = vadd.f32 %v365_v41, %v252_v38 }
  0xda   :  { %484 = vst [vmem:[%s718_s2 + $0x60] sm:$0xff] %v468_v37  ;;  %v368_v9 = vpop.f32.mrf.mxu1 }
  0xdb   :  { %480 = vst [vmem:[%s718_s2 + $0x40] sm:$0xff] %v464_v40 }
  0xdf   :  { %v448_v30 = vpop.f32.mrf.mxu3 }
  0xe0   :  { %v469_v43 = vadd.f32 %v448_v30, %v376_v42  ;;  %v438_v44 = vpop.f32.mrf.mxu2  ;;  %v255_v8 = vpop.f32.mrf.mxu0 }
  0xe1   :  { %v465_v45 = vadd.f32 %v438_v44, %v366_v29  ;;  %v369_v47 = vadd.f32 %v368_v9, %v255_v8 }
  0xe2   :  { %485 = vst [vmem:[%s718_s2 + $0x68] sm:$0xff] %v469_v43  ;;  %v370_v54 = vpop.f32.mrf.mxu1 }
  0xe3   :  { %481 = vst [vmem:[%s718_s2 + $0x48] sm:$0xff] %v465_v45 }
  0xe7   :  { %v451_v48 = vpop.f32.mrf.mxu3 }
  0xe8   :  { %v470_v24 = vadd.f32 %v451_v48, %v379_v23  ;;  %v441_v49 = vpop.f32.mrf.mxu2  ;;  %v257_v51 = vpop.f32.mrf.mxu0 }
  0xe9   :  { %v466_v50 = vadd.f32 %v441_v49, %v369_v47  ;;  %v371_v55 = vadd.f32 %v370_v54, %v257_v51 }
  0xea   :  { %486 = vst [vmem:[%s718_s2 + $0x70] sm:$0xff] %v470_v24 }
  0xeb   :  { %482 = vst [vmem:[%s718_s2 + $0x50] sm:$0xff] %v466_v50 }
  0xef   :  { %v453_v57 = vpop.f32.mrf.mxu3 }
  0xf0   :  { %v471_v59 = vadd.f32 %v453_v57, %v381_v52  ;;  %v443_v61 = vpop.f32.mrf.mxu2 }
  0xf1   :  { %v467_v62 = vadd.f32 %v443_v61, %v371_v55 }
  0xf2   :  { %487 = vst [vmem:[%s718_s2 + $0x78] sm:$0xff] %v471_v59 }
  0xf3   :  { %483 = vst [vmem:[%s718_s2 + $0x58] sm:$0xff] %v467_v62 }
  0xf4   :  { %492 = vsyncpa [#allocation3], 1 }

</bundles_post_ra>
